<compile_context>
chip_gen: v7x
topology: tpu7x:2x2x1
jax: 0.10.0
libtpu: 0.0.40
codegen_flags: <defaults>
</compile_context>

<pallas_src>
import jax
import jax.numpy as jnp
from jax.experimental import pallas as pl
from jax.experimental.pallas import tpu as pltpu

_LANE = 128
_SUBLANE = 8


def _pointwise_conv_kernel(w_ref, b_ref, x_ref, o_ref):
    # w_ref: SMEM (L, C) f32 (scalar prefetch); b_ref: SMEM (L,) f32.
    # x_ref: VMEM (1, C, TR, 128); o_ref: VMEM (1, L, TR, 128).
    C = x_ref.shape[1]
    L = o_ref.shape[1]
    # Load each input channel slab once; each is a dense (TR, 128) plane.
    xs = [x_ref[0, c, :, :].astype(jnp.float32) for c in range(C)]
    for l in range(L):
        acc = xs[0] * w_ref[l, 0]
        for c in range(1, C):
            acc = acc + xs[c] * w_ref[l, c]
        o_ref[0, l, :, :] = (acc + b_ref[l]).astype(o_ref.dtype)


def _default_tile_rows():
    # v7x: 3.2 TB/s HBM -> bigger tiles to amortize per-step overhead, but its
    # 64 MiB per-TC VMEM caps us around 4096 rows.  v5e/v6e: 2048 rows.
    try:
        kind = jax.devices()[0].device_kind.lower()
    except Exception:
        kind = ""
    return 4096 if "v7" in kind else 2048


def pointwise_conv3d(x_ncdhw, weight, bias, *, tile_rows=None):
    """1x1x1 Conv3d over NCDHW input == per-voxel channel linear map + bias.

    x_ncdhw: (N, C, D, H, W)
    weight:  (L, C)   (PyTorch Conv3d weight (L, C, 1, 1, 1) squeezed)
    bias:    (L,)
    returns: (N, L, D, H, W)
    """
    N, C, D, H, W = x_ncdhw.shape
    L = weight.shape[0]
    S = D * H * W
    itemsize = jnp.dtype(x_ncdhw.dtype).itemsize

    if tile_rows is None:
        tile_rows = _default_tile_rows()

    # Pad flattened spatial axis to a multiple of 128 -> every block lane-dense.
    S_pad = pl.cdiv(S, _LANE) * _LANE
    x_flat = x_ncdhw.reshape(N, C, S)
    if S_pad != S:
        x_flat = jnp.pad(x_flat, ((0, 0), (0, 0), (0, S_pad - S)))
    R = S_pad // _LANE
    x_r = x_flat.reshape(N, C, R, _LANE)

    # Tile rows: cap by a double-buffered VMEM budget (~28 MiB, safe on v7x's
    # 64 MiB per-core VMEM), then by the array itself.
    vmem_budget = 28 * 1024 * 1024
    per_row = (C + L) * _LANE * max(itemsize, 4) * 2  # x2 double-buffering
    cap = max(_SUBLANE, (vmem_budget // per_row) // _SUBLANE * _SUBLANE)
    tr = min(tile_rows, cap, R)
    if tr < R:
        # Block sublane dim must be a multiple of 8 unless it equals the full dim.
        tr = max(_SUBLANE, (tr // _SUBLANE) * _SUBLANE)
    # Keep >=2 spatial tiles when N == 1 so both v7x TensorCores get work.
    if N == 1 and tr == R and R >= 2 * _SUBLANE:
        tr = max(_SUBLANE, ((R // 2) // _SUBLANE) * _SUBLANE)

    grid = (N, pl.cdiv(R, tr))
    # index_maps receive the scalar-prefetch refs as trailing positional args.
    imap = lambda n, t, w_s, b_s: (n, 0, t, 0)

    w = weight.astype(jnp.float32)  # (L, C) -> SMEM via scalar prefetch
    b = bias.astype(jnp.float32)    # (L,)

    step_bytes = (C + L) * tr * _LANE * itemsize
    vmem_limit = int(min(48 * 1024 * 1024,
                         max(32 * 1024 * 1024, 2 * step_bytes + 16 * 1024 * 1024)))

    cost = pl.CostEstimate(
        flops=2 * N * S * C * L,
        transcendentals=0,
        bytes_accessed=(N * C * S + N * L * S) * itemsize + (L * C + L) * 4,
    )

    out_r = pl.pallas_call(
        _pointwise_conv_kernel,
        out_shape=jax.ShapeDtypeStruct((N, L, R, _LANE), x_ncdhw.dtype),
        grid_spec=pltpu.PrefetchScalarGridSpec(
            num_scalar_prefetch=2,
            grid=grid,
            in_specs=[pl.BlockSpec((1, C, tr, _LANE), imap)],
            out_specs=pl.BlockSpec((1, L, tr, _LANE), imap),
        ),
        compiler_params=pltpu.CompilerParams(
            dimension_semantics=("parallel", "parallel"),
            vmem_limit_bytes=vmem_limit,
        ),
        cost_estimate=cost,
    )(w, b, x_r)

    out_flat = out_r.reshape(N, L, S_pad)
    if S_pad != S:
        out_flat = out_flat[:, :, :S]
    return out_flat.reshape(N, L, D, H, W)


class OutputTransitionPallas:
    """JAX/Pallas equivalent of SupreM.OutputTransition (forward only).

    The PyTorch module defines self.sigmoid but never applies it in forward,
    so it is intentionally omitted here as well.
    """

    def __init__(self, inChans, n_labels, key):
        kw, kb = jax.random.split(key)
        bound = 1.0 / jnp.sqrt(inChans)  # kernel_size=1 -> fan_in = inChans
        self.weight = jax.random.uniform(
            kw, (n_labels, inChans), jnp.float32, -bound, bound)
        self.bias = jax.random.uniform(
            kb, (n_labels,), jnp.float32, -bound, bound)

    def __call__(self, x):
        return pointwise_conv3d(x, self.weight, self.bias)


def _reference(x, weight, bias):
    return (jnp.einsum("ncdhw,lc->nldhw", x, weight)
            + bias[None, :, None, None, None])


if __name__ == "__main__":
    key = jax.random.PRNGKey(0)
    k_x1, k_x2, k_x3, k_p = jax.random.split(key, 4)

    N, C, n_labels = 2, 4, 3
    mod = OutputTransitionPallas(C, n_labels, k_p)

    # Case 1: spatial size divisible by 128 (pure lane-dense path, no pad).
    x1 = jax.random.normal(k_x1, (N, C, 8, 8, 8), dtype=jnp.float32)
    out1 = jax.block_until_ready(mod(x1))
    ref1 = _reference(x1, mod.weight, mod.bias)
    assert out1.shape == (N, n_labels, 8, 8, 8)
    assert jnp.allclose(out1, ref1, atol=1e-5, rtol=1e-5)

    # Case 2: spatial size NOT a multiple of 128 (pad-to-128 + slice tail).
    x2 = jax.random.normal(k_x2, (N, C, 3, 5, 7), dtype=jnp.float32)
    out2 = jax.block_until_ready(mod(x2))
    ref2 = _reference(x2, mod.weight, mod.bias)
    assert out2.shape == (N, n_labels, 3, 5, 7)
    assert jnp.allclose(out2, ref2, atol=1e-5, rtol=1e-5)

    # Case 3: N == 1 (spatial axis forced to >=2 grid steps for 2-core v7x).
    x3 = jax.random.normal(k_x3, (1, C, 16, 16, 16), dtype=jnp.float32)
    out3 = jax.block_until_ready(mod(x3))
    ref3 = _reference(x3, mod.weight, mod.bias)
    assert out3.shape == (1, n_labels, 16, 16, 16)
    assert jnp.allclose(out3, ref3, atol=1e-5, rtol=1e-5)

    print("KERNEL_OK")
</pallas_src>

<mosaic_0001>
module attributes {stable_mosaic.version = 11 : i64} {
  func.func @_pointwise_conv_kernel(%arg0: i32, %arg1: i32, %arg2: memref<3x4xf32, #tpu.memory_space<smem>>, %arg3: memref<3xf32, #tpu.memory_space<smem>>, %arg4: memref<1x4x4x128xf32, #tpu.memory_space<vmem>>, %arg5: memref<1x3x4x128xf32, #tpu.memory_space<vmem>>) attributes {dimension_semantics = [#tpu.dimension_semantics<parallel>, #tpu.dimension_semantics<parallel>], iteration_bounds = array<i64: 2, 1>, scalar_prefetch = 2 : i64, scratch_operands = 0 : i64, tpu.core_type = #tpu.core_type<tc>, window_params = [{transform_indices = @transform_0, window_bounds = array<i64: 1, 4, 4, 128>}, {transform_indices = @transform_1, window_bounds = array<i64: 1, 3, 4, 128>}]} {
    %c0 = arith.constant 0 : index
    %c0_0 = arith.constant 0 : index
    %c0_1 = arith.constant 0 : index
    %c0_2 = arith.constant 0 : index
    %0 = vector.load %arg4[%c0, %c0_0, %c0_1, %c0_2] : memref<1x4x4x128xf32, #tpu.memory_space<vmem>>, vector<1x1x4x128xf32>
    %1 = vector.shape_cast %0 : vector<1x1x4x128xf32> to vector<4x128xf32>
    %c0_3 = arith.constant 0 : index
    %c1 = arith.constant 1 : index
    %c0_4 = arith.constant 0 : index
    %c0_5 = arith.constant 0 : index
    %2 = vector.load %arg4[%c0_3, %c1, %c0_4, %c0_5] : memref<1x4x4x128xf32, #tpu.memory_space<vmem>>, vector<1x1x4x128xf32>
    %3 = vector.shape_cast %2 : vector<1x1x4x128xf32> to vector<4x128xf32>
    %c0_6 = arith.constant 0 : index
    %c2 = arith.constant 2 : index
    %c0_7 = arith.constant 0 : index
    %c0_8 = arith.constant 0 : index
    %4 = vector.load %arg4[%c0_6, %c2, %c0_7, %c0_8] : memref<1x4x4x128xf32, #tpu.memory_space<vmem>>, vector<1x1x4x128xf32>
    %5 = vector.shape_cast %4 : vector<1x1x4x128xf32> to vector<4x128xf32>
    %c0_9 = arith.constant 0 : index
    %c3 = arith.constant 3 : index
    %c0_10 = arith.constant 0 : index
    %c0_11 = arith.constant 0 : index
    %6 = vector.load %arg4[%c0_9, %c3, %c0_10, %c0_11] : memref<1x4x4x128xf32, #tpu.memory_space<vmem>>, vector<1x1x4x128xf32>
    %7 = vector.shape_cast %6 : vector<1x1x4x128xf32> to vector<4x128xf32>
    %c0_12 = arith.constant 0 : index
    %c0_13 = arith.constant 0 : index
    %8 = memref.load %arg2[%c0_12, %c0_13] : memref<3x4xf32, #tpu.memory_space<smem>>
    %9 = vector.broadcast %8 : f32 to vector<4x128xf32>
    %10 = arith.mulf %1, %9 : vector<4x128xf32>
    %c0_14 = arith.constant 0 : index
    %c1_15 = arith.constant 1 : index
    %11 = memref.load %arg2[%c0_14, %c1_15] : memref<3x4xf32, #tpu.memory_space<smem>>
    %12 = vector.broadcast %11 : f32 to vector<4x128xf32>
    %13 = arith.mulf %3, %12 : vector<4x128xf32>
    %14 = arith.addf %10, %13 : vector<4x128xf32>
    %c0_16 = arith.constant 0 : index
    %c2_17 = arith.constant 2 : index
    %15 = memref.load %arg2[%c0_16, %c2_17] : memref<3x4xf32, #tpu.memory_space<smem>>
    %16 = vector.broadcast %15 : f32 to vector<4x128xf32>
    %17 = arith.mulf %5, %16 : vector<4x128xf32>
    %18 = arith.addf %14, %17 : vector<4x128xf32>
    %c0_18 = arith.constant 0 : index
    %c3_19 = arith.constant 3 : index
    %19 = memref.load %arg2[%c0_18, %c3_19] : memref<3x4xf32, #tpu.memory_space<smem>>
    %20 = vector.broadcast %19 : f32 to vector<4x128xf32>
    %21 = arith.mulf %7, %20 : vector<4x128xf32>
    %22 = arith.addf %18, %21 : vector<4x128xf32>
    %c0_20 = arith.constant 0 : index
    %23 = memref.load %arg3[%c0_20] : memref<3xf32, #tpu.memory_space<smem>>
    %24 = vector.broadcast %23 : f32 to vector<4x128xf32>
    %25 = arith.addf %22, %24 : vector<4x128xf32>
    %c0_21 = arith.constant 0 : index
    %c0_22 = arith.constant 0 : index
    %c0_23 = arith.constant 0 : index
    %c0_24 = arith.constant 0 : index
    %26 = vector.load %arg5[%c0_21, %c0_22, %c0_23, %c0_24] : memref<1x3x4x128xf32, #tpu.memory_space<vmem>>, vector<1x1x4x128xf32>
    %27 = vector.shape_cast %26 : vector<1x1x4x128xf32> to vector<4x128xf32>
    %28 = vector.shape_cast %25 : vector<4x128xf32> to vector<1x1x4x128xf32>
    tpu.vector_store %arg5[%c0_21, %c0_22, %c0_23, %c0_24], %28 {strides = array<i32>} : memref<1x3x4x128xf32, #tpu.memory_space<vmem>>, vector<1x1x4x128xf32>,
    %c1_25 = arith.constant 1 : index
    %c0_26 = arith.constant 0 : index
    %29 = memref.load %arg2[%c1_25, %c0_26] : memref<3x4xf32, #tpu.memory_space<smem>>
    %30 = vector.broadcast %29 : f32 to vector<4x128xf32>
    %31 = arith.mulf %1, %30 : vector<4x128xf32>
    %c1_27 = arith.constant 1 : index
    %c1_28 = arith.constant 1 : index
    %32 = memref.load %arg2[%c1_27, %c1_28] : memref<3x4xf32, #tpu.memory_space<smem>>
    %33 = vector.broadcast %32 : f32 to vector<4x128xf32>
    %34 = arith.mulf %3, %33 : vector<4x128xf32>
    %35 = arith.addf %31, %34 : vector<4x128xf32>
    %c1_29 = arith.constant 1 : index
    %c2_30 = arith.constant 2 : index
    %36 = memref.load %arg2[%c1_29, %c2_30] : memref<3x4xf32, #tpu.memory_space<smem>>
    %37 = vector.broadcast %36 : f32 to vector<4x128xf32>
    %38 = arith.mulf %5, %37 : vector<4x128xf32>
    %39 = arith.addf %35, %38 : vector<4x128xf32>
    %c1_31 = arith.constant 1 : index
    %c3_32 = arith.constant 3 : index
    %40 = memref.load %arg2[%c1_31, %c3_32] : memref<3x4xf32, #tpu.memory_space<smem>>
    %41 = vector.broadcast %40 : f32 to vector<4x128xf32>
    %42 = arith.mulf %7, %41 : vector<4x128xf32>
    %43 = arith.addf %39, %42 : vector<4x128xf32>
    %c1_33 = arith.constant 1 : index
    %44 = memref.load %arg3[%c1_33] : memref<3xf32, #tpu.memory_space<smem>>
    %45 = vector.broadcast %44 : f32 to vector<4x128xf32>
    %46 = arith.addf %43, %45 : vector<4x128xf32>
    %c0_34 = arith.constant 0 : index
    %c1_35 = arith.constant 1 : index
    %c0_36 = arith.constant 0 : index
    %c0_37 = arith.constant 0 : index
    %47 = vector.load %arg5[%c0_34, %c1_35, %c0_36, %c0_37] : memref<1x3x4x128xf32, #tpu.memory_space<vmem>>, vector<1x1x4x128xf32>
    %48 = vector.shape_cast %47 : vector<1x1x4x128xf32> to vector<4x128xf32>
    %49 = vector.shape_cast %46 : vector<4x128xf32> to vector<1x1x4x128xf32>
    tpu.vector_store %arg5[%c0_34, %c1_35, %c0_36, %c0_37], %49 {strides = array<i32>} : memref<1x3x4x128xf32, #tpu.memory_space<vmem>>, vector<1x1x4x128xf32>,
    %c2_38 = arith.constant 2 : index
    %c0_39 = arith.constant 0 : index
    %50 = memref.load %arg2[%c2_38, %c0_39] : memref<3x4xf32, #tpu.memory_space<smem>>
    %51 = vector.broadcast %50 : f32 to vector<4x128xf32>
    %52 = arith.mulf %1, %51 : vector<4x128xf32>
    %c2_40 = arith.constant 2 : index
    %c1_41 = arith.constant 1 : index
    %53 = memref.load %arg2[%c2_40, %c1_41] : memref<3x4xf32, #tpu.memory_space<smem>>
    %54 = vector.broadcast %53 : f32 to vector<4x128xf32>
    %55 = arith.mulf %3, %54 : vector<4x128xf32>
    %56 = arith.addf %52, %55 : vector<4x128xf32>
    %c2_42 = arith.constant 2 : index
    %c2_43 = arith.constant 2 : index
    %57 = memref.load %arg2[%c2_42, %c2_43] : memref<3x4xf32, #tpu.memory_space<smem>>
    %58 = vector.broadcast %57 : f32 to vector<4x128xf32>
    %59 = arith.mulf %5, %58 : vector<4x128xf32>
    %60 = arith.addf %56, %59 : vector<4x128xf32>
    %c2_44 = arith.constant 2 : index
    %c3_45 = arith.constant 3 : index
    %61 = memref.load %arg2[%c2_44, %c3_45] : memref<3x4xf32, #tpu.memory_space<smem>>
    %62 = vector.broadcast %61 : f32 to vector<4x128xf32>
    %63 = arith.mulf %7, %62 : vector<4x128xf32>
    %64 = arith.addf %60, %63 : vector<4x128xf32>
    %c2_46 = arith.constant 2 : index
    %65 = memref.load %arg3[%c2_46] : memref<3xf32, #tpu.memory_space<smem>>
    %66 = vector.broadcast %65 : f32 to vector<4x128xf32>
    %67 = arith.addf %64, %66 : vector<4x128xf32>
    %c0_47 = arith.constant 0 : index
    %c2_48 = arith.constant 2 : index
    %c0_49 = arith.constant 0 : index
    %c0_50 = arith.constant 0 : index
    %68 = vector.load %arg5[%c0_47, %c2_48, %c0_49, %c0_50] : memref<1x3x4x128xf32, #tpu.memory_space<vmem>>, vector<1x1x4x128xf32>
    %69 = vector.shape_cast %68 : vector<1x1x4x128xf32> to vector<4x128xf32>
    %70 = vector.shape_cast %67 : vector<4x128xf32> to vector<1x1x4x128xf32>
    tpu.vector_store %arg5[%c0_47, %c2_48, %c0_49, %c0_50], %70 {strides = array<i32>} : memref<1x3x4x128xf32, #tpu.memory_space<vmem>>, vector<1x1x4x128xf32>,
    return
  }
  func.func @transform_0(%arg0: i32, %arg1: i32, %arg2: memref<3x4xf32, #tpu.memory_space<smem>>, %arg3: memref<3xf32, #tpu.memory_space<smem>>) -> (i32, i32, i32, i32) {
    %c0_i32 = arith.constant 0 : i32
    %c0_i32_0 = arith.constant 0 : i32
    %c0_i32_1 = arith.constant 0 : i32
    return %arg0, %c0_i32, %arg1, %c0_i32_0 : i32, i32, i32, i32
  }
  func.func @transform_1(%arg0: i32, %arg1: i32, %arg2: memref<3x4xf32, #tpu.memory_space<smem>>, %arg3: memref<3xf32, #tpu.memory_space<smem>>) -> (i32, i32, i32, i32) {
    %c0_i32 = arith.constant 0 : i32
    %c0_i32_0 = arith.constant 0 : i32
    %c0_i32_1 = arith.constant 0 : i32
    return %arg0, %c0_i32, %arg1, %c0_i32_0 : i32, i32, i32, i32
  }
}

</mosaic_0001>

<bundles_post_ra>
// kernel: tpu_custom_call.1
= control target key start
LH: loop header
LB: loop body
LE: loop exit
PB: predicated region body
PF: predicated region fallthrough
CT: control target
= control target key end

     0   :  { %s795_s0 = inlined_call_operand.hbm [shape: f32[3,4], index: 0, kind: input, shape index: {}]   ;;  %s796_s2 = inlined_call_operand.hbm [shape: f32[2,4,4,128], index: 2, kind: input, shape index: {}]   ;;  %s797_s3 = inlined_call_operand.hbm [shape: f32[2,3,4,128], index: 3, kind: output, shape index: {}]   ;;  %s798_s1 = inlined_call_operand.vmem [shape: f32[3], index: 1, kind: input, shape index: {}]  }
   0x1   :  { %s429_s14 = scalar_lea.hbm %s795_s0, 64 }
   0x2   :  { %p430_p0 = scmp.ne.s32.totalorder %s795_s0, %s429_s14  ;;  %p433_p1 = scmp.lt.u32.totalorder %s429_s14, %s795_s0 }
   0x4   :  { %p435_p2 = pnand %p433_p1, %p430_p0 }
   0x6   :  { %438 = shalt.err (!%p435_p2)  }
   0x7   :  { %s567_s19 = smov [#allocation3]   ;;  %s10_s24 = sshll.u32 %s798_s1, 4  ;;  %s11_s24 = int_to_ptr.vmem [resolvable:$true] %s10_s24 }
   0x8   :  { %9 = dma.hbm_to_smem %s795_s0, 64, %s567_s19, [#allocation2] }
   0x9   :  { %s439_s25 = scalar_lea.vmem %s11_s24, 16  ;;  %p444_p4 = scmp.lt.s32.totalorder %s11_s24, %s11_s24 }
   0xa   :  { %p440_p3 = scmp.ne.s32.totalorder %s11_s24, %s439_s25  ;;  %p445_p5 = scmp.lt.s32.totalorder %s439_s25, %s439_s25 }
   0xc   :  { %p446_p6 = por %p445_p5, %p444_p4 }
   0xe   :  { %p447_p7 = pnand %p446_p6, %p440_p3 }
  0x10   :  { %450 = shalt.err (!%p447_p7)  }
  0x11   :  { %s568_s26 = smov [#allocation4]  }
  0x12   :  { %13 = dma.vmem_to_smem %s11_s24, 16, %s568_s26, [#allocation2] }
  0x13   :  { %533 = dma.done.wait [#allocation2], 80 }
  0x14   :  { %534 = vsyncadd [#allocation2], 4294967216 }
  0x15   :  { %15 = sfence }
  0x16   :  { %16 = vsyncpa [#allocation6], 0 }
  0x17   :  { %18 = vsyncpa [#allocation6 + $0x1], 0 }
  0x18   :  { %19 = vsyncpa [#allocation7], 0 }
  0x19   :  { %21 = vsyncpa [#allocation7 + $0x1], 0  ;;  %s610_s0 = smov 0   ;;  %s612_s1 = smov 0  }
  0x1a   :  { %s614_s27 = smov 0   ;;  %s616_s28 = smov 0  }
  0x1b   :  { %s618_s29 = smov 0   ;;  %s620_s30 = smov 0  }
  0x1c LB: > { %s328_s4 = sadd.s32 4294967295, %s565_s30   ;;  %s329_s5 = sadd.s32 4294967294, %s565_s30   ;;  %s565_s30 = sphi %s620_s30, %s27_s30   ;;  %s561_s29 = sphi %s618_s29, %s813_s29   ;;  %s557_s28 = sphi %s616_s28, %s812_s28   ;;  %s553_s27 = sphi %s614_s27, %s811_s27   ;;  %s549_s1 = sphi %s612_s1, %s810_s1   ;;  %s545_s0 = sphi %s610_s0, %s809_s0  }
  0x1d   : > { %s39_s6 = sadd.s32 1, %s561_s29  ;;  %s48_s7 = sadd.s32 1, %s553_s27 }
  0x1e   : > { %p41_p8 = scmp.ge.s32.totalorder %s39_s6, 2  ;;  %p55_p9 = scmp.ne.s32.totalorder %s553_s27, %s549_s1 }
  0x1f   : > { %p56_p10 = scmp.eq.s32.totalorder %s565_s30, 0  ;;  %p61_p11 = scmp.ne.s32.totalorder %s549_s1, %s545_s0 }
  0x20   : > { %s815_s6 = smov (%p41_p8, %s39_s6), 0  ;;  %p62_p13 = scmp.eq.s32.totalorder %s328_s4, 0 }
  0x21   : > { %p651_p12 = por %p56_p10, %p55_p9  ;;  %s43_s9 = ssub.s32 %s561_s29, %s815_s6 }
  0x22   : > { %p87_p0 = scmp.eq.s32.totalorder %s328_s4, 1  ;;  %p46_p1 = scmp.eq.s32.totalorder %s43_s9, 0 }
  0x23   : > { %p657_p2 = por %p62_p13, %p61_p11  ;;  %p93_p4 = scmp.eq.s32.totalorder %s329_s5, 1 }
  0x24   : > { %p661_p3 = por %p87_p0, %p55_p9  ;;  %p373_p7 = scmp.lt.s32.totalorder %s565_s30, 2 }
  0x25   : > { %s666_s12 = scalar_select %p46_p1, %s553_s27, %s48_s7  }
  0x26   : > { %s802_s11 = scalar_select %p661_p3, 1, 0 }
  0x27   : > { %p668_p5 = por %p93_p4, %p61_p11  ;;  %s113_s14 = sand.u32 1, %s553_s27  }
  0x28   : > { %s332_s15 = sshll.u32 %s113_s14, 4  ;;  %s358_s16 = sshll.u32 %s561_s29, 8 }
  0x29   : > { %s803_s13 = scalar_select %p668_p5, 1, 0 }
  0x2a   : > { %s679_s19 = scalar_lea.hbm %s796_s2, %s358_s16  ;;  %s117_s20 = scalar_lea.vmem [#allocation5], %s332_s15 }
  0x2b   : > { %s125_s21 = sshll.u32 %s117_s20, 4  ;;  %p685_p8 = pnand %p373_p7, %p651_p12  ;;  %s681_s21 = int_to_ptr.vmem [resolvable:$true] %s125_s21 }
  0x2c   : > { %s690_s23 = scalar_lea.sflag [#allocation6], %s113_s14  ;;  %s451_s24 = scalar_lea.hbm %s679_s19, 256 }
  0x2d   : > { %p452_p10 = scmp.ne.s32.totalorder %s679_s19, %s451_s24  ;;  %p453_p11 = pneg %p685_p8 }
  0x2e   : > { %s456_s4 = scalar_lea.hbm %s796_s2, 512  ;;  %p457_p12 = scmp.lt.u32.totalorder %s679_s19, %s796_s2 }
  0x2f   : > { %p454_p13 = pnand %p453_p11, %p452_p10  ;;  %p458_p1 = scmp.lt.u32.totalorder %s456_s4, %s451_s24 }
  0x30   : > { %p460_p7 = scmp.lt.u32.totalorder %s451_s24, %s679_s19 }
  0x31   : > { %p455_p0 = pneg %p454_p13  ;;  %p459_p4 = por %p458_p1, %p457_p12 }
  0x33   : > { %p461_p6 = por %p460_p7, %p459_p4 }
  0x35   : > { %p462_p9 = pnand %p461_p6, %p455_p0 }
  0x37   : > { %465 = shalt.err (!%p462_p9)
}
  0x38   : > { %s466_s8 = scalar_lea.vmem %s681_s21, 256  ;;  %s569_s9 = smov [#allocation5]  }
  0x39   : > { %p467_p10 = scmp.ne.s32.totalorder %s681_s21, %s466_s8  ;;  %s471_s14 = sshll.u32 %s569_s9, 4  ;;  %s472_s14 = int_to_ptr.vmem [resolvable:$false] %s471_s14 }
  0x3a   : > { %s473_s15 = scalar_lea.vmem %s472_s14, 512  ;;  %p474_p3 = scmp.lt.s32.totalorder %s681_s21, %s472_s14 }
  0x3b   : > { %p469_p13 = pnand %p467_p10, %p453_p11  ;;  %p475_p12 = scmp.lt.s32.totalorder %s473_s15, %s466_s8 }
  0x3d   : > { %p470_p5 = pneg %p469_p13  ;;  %p476_p1 = por %p475_p12, %p474_p3 }
  0x3f   : > { %p477_p4 = pnand %p476_p1, %p470_p5 }
  0x41   : > { %480 = shalt.err (!%p477_p4)
}
  0x42   : > { %s570_s16 = smov 64   ;;  %s571_s17 = smov 4  }
  0x43   : > { %368 = dma.hbm_to_vmem [thread:$0]  (!%p685_p8), %s679_s19, 256, %s681_s21, %s690_s23, %s570_s16, %s570_s16, %s571_s17  }
  0x44   : > { %p133_p6 = scmp.lt.s32.totalorder %s565_s30, 3  ;;  %p805_p9 = scmp.ge.s32.totalorder %s565_s30, 1 }
  0x46   : > { %p134_p11 = pnand %p805_p9, %p133_p6 }
  0x47   : > { %s722_s18 = sand.u32 (!%p134_p11), 1, %s549_s1  }
  0x48   : > { %137 = sbr.rel (%p134_p11) target bundleno = 118 (0x76), region = 24  ;;  %s336_s20 = sshll.u32 (!%p134_p11), %s722_s18, 4 }
  0x49   : > { %s140_s24 = scalar_lea.sflag (!%p134_p11), [#allocation6], %s722_s18  ;;  %s143_s25 = scalar_lea.vmem (!%p134_p11), [#allocation5], %s336_s20 }
  0x4f   : > { %536 = dma.done.wait (%p657_p2), %s140_s24, 256  }
  0x50   : > { %538 = vsyncadd (%p657_p2), %s140_s24, 4294967040  ;;  %s169_s22 = sld [smem:[#allocation3]]  ;;  %s340_s19 = sld [smem:[#allocation3 + $0x1]]  ;;  %v162_v0 = vld [vmem:[%s143_s25] sm:$0xf] }
  0x51   : > { %s341_s21 = sld [smem:[#allocation3 + $0x2]]  ;;  %s342_s23 = sld [smem:[#allocation3 + $0x3]]  ;;  %v337_v1 = vld [vmem:[%s143_s25 + $0x4] sm:$0xf]  ;;  %v338_v2 = vld [vmem:[%s143_s25 + $0x8] sm:$0xf] }
  0x52   : > { %s343_s26 = sld [smem:[#allocation3 + $0x80]]  ;;  %s344_s5 = sld [smem:[#allocation3 + $0x81]]  ;;  %v339_v4 = vld [vmem:[%s143_s25 + $0xc] sm:$0xf] }
  0x53   : > { %s730_s4 = sld [smem:[#allocation4]]  ;;  %s345_s7 = sld [smem:[#allocation3 + $0x82]] }
  0x54   : > { %s732_s8 = sld [smem:[#allocation3 + $0x83]]  ;;  %s734_s10 = sld [smem:[#allocation4 + $0x1]] }
  0x55   : > { %s349_s9 = sld [smem:[#allocation3 + $0x100]]  ;;  %s350_s14 = sld [smem:[#allocation3 + $0x101]] }
  0x56   : > { %v170_v3 = vstv %s169_s22  ;;  %v173_v6 = vstv %s340_s19  ;;  %s351_s15 = sld [smem:[#allocation3 + $0x102]]  ;;  %s352_s16 = sld [smem:[#allocation3 + $0x103]] }
  0x57   : > { %v171_v5 = vmul.f32 %v170_v3, %v162_v0  ;;  %v177_v7 = vstv %s341_s21  ;;  %v174_v8 = vmul.f32 %v337_v1, %v173_v6  ;;  %v181_v10 = vstv %s342_s23  ;;  %s359_s17 = smul.u32 12, %s722_s18  ;;  %s353_s20 = sld [smem:[#allocation4 + $0x2]] }
  0x58   : > { %v178_v9 = vmul.f32 %v338_v2, %v177_v7  ;;  %v189_v11 = vstv %s343_s26  ;;  %v182_v13 = vmul.f32 %v339_v4, %v181_v10  ;;  %v192_v15 = vstv %s344_s5  ;;  %s360_s22 = smul.u32 192, %s557_s28  ;;  %s229_s26 = scalar_lea.sflag [#allocation7], %s722_s18 }
  0x59   : > { %v175_v12 = vadd.f32 %v174_v8, %v171_v5  ;;  %v190_v14 = vmul.f32 %v189_v11, %v162_v0  ;;  %v193_v16 = vmul.f32 %v337_v1, %v192_v15  ;;  %v196_v17 = vstv %s345_s7  ;;  %s161_s24 = scalar_lea.vmem [#allocation8], %s359_s17  ;;  %p806_p3 = scmp.ne.s32.totalorder %s802_s11, 0 }
  0x5a   : > { %v200_v18 = vstv %s732_s8  ;;  %v197_v20 = vmul.f32 %v338_v2, %v196_v17  ;;  %v185_v21 = vstv %s730_s4  ;;  %v204_v34 = vstv %s734_s10  ;;  %s243_s25 = sshll.u32 %s161_s24, 4  ;;  %s746_s23 = scalar_lea.hbm %s797_s3, %s360_s22  ;;  %s741_s25 = int_to_ptr.vmem [resolvable:$true] %s243_s25 }
  0x5b   : > { %v179_v19 = vadd.f32 %v178_v9, %v175_v12  ;;  %v194_v22 = vadd.f32 %v193_v16, %v190_v14  ;;  %v201_v23 = vmul.f32 %v339_v4, %v200_v18  ;;  %v209_v24 = vstv %s349_s9  ;;  %s481_s4 = scalar_lea.vmem %s741_s25, 192  ;;  %s572_s28 = smov [#allocation8]  }
  0x5c   : > { %v210_v26 = vmul.f32 %v209_v24, %v162_v0  ;;  %v212_v27 = vstv %s350_s14  ;;  %v216_v28 = vstv %s351_s15  ;;  %v220_v32 = vstv %s352_s16  ;;  %p482_p2 = scmp.ne.s32.totalorder %s741_s25, %s481_s4  ;;  %s485_s5 = sshll.u32 %s572_s28, 4  ;;  %s486_s5 = int_to_ptr.vmem [resolvable:$false] %s485_s5 }
  0x5d   : > { %v183_v25 = vadd.f32 %v182_v13, %v179_v19  ;;  %v198_v29 = vadd.f32 %v197_v20, %v194_v22  ;;  %v213_v30 = vmul.f32 %v337_v1, %v212_v27  ;;  %v217_v31 = vmul.f32 %v338_v2, %v216_v28  ;;  %s487_s7 = scalar_lea.vmem %s486_s5, 384  ;;  %p488_p0 = scmp.lt.s32.totalorder %s741_s25, %s486_s5 }
  0x5e   : > { %v221_v37 = vmul.f32 %v339_v4, %v220_v32  ;;  %v224_v40 = vstv %s353_s20  ;;  %p483_p5 = pnand %p482_p2, %p806_p3  ;;  %p489_p7 = scmp.lt.s32.totalorder %s487_s7, %s481_s4 }
  0x5f   : > { %v186_v33 = vadd.f32 %v185_v21, %v183_v25  ;;  %v202_v35 = vadd.f32 %v201_v23, %v198_v29  ;;  %v214_v36 = vadd.f32 %v213_v30, %v210_v26 }
  0x60   : > { %p484_p8 = pneg %p483_p5  ;;  %p490_p10 = por %p489_p7, %p488_p0 }
  0x61   : > { %187 = vst [vmem:[%s161_s24] sm:$0xf] %v186_v33  ;;  %v205_v38 = vadd.f32 %v204_v34, %v202_v35  ;;  %v218_v39 = vadd.f32 %v217_v31, %v214_v36 }
  0x62   : > { %p491_p13 = pnand %p490_p10, %p484_p8 }
  0x63   : > { %348 = vst [vmem:[%s161_s24 + $0x4] sm:$0xf] %v205_v38  ;;  %v222_v41 = vadd.f32 %v221_v37, %v218_v39 }
  0x65   : > { %v225_v42 = vadd.f32 %v224_v40, %v222_v41 }
  0x67   : > { %354 = vst [vmem:[%s161_s24 + $0x8] sm:$0xf] %v225_v42 }
  0x68   : > { %494 = shalt.err (!%p491_p13)
}
  0x69   : > { %s495_s8 = scalar_lea.hbm %s746_s23, 192  ;;  %s499_s14 = scalar_lea.hbm %s797_s3, 384 }
  0x6a   : > { %p496_p12 = scmp.ne.s32.totalorder %s746_s23, %s495_s8  ;;  %p500_p6 = scmp.lt.u32.totalorder %s746_s23, %s797_s3 }
  0x6b   : > { %p501_p9 = scmp.lt.u32.totalorder %s499_s14, %s495_s8  ;;  %p503_p2 = scmp.lt.u32.totalorder %s495_s8, %s746_s23 }
  0x6c   : > { %p497_p1 = pnand %p496_p12, %p806_p3 }
  0x6d   : > { %p502_p11 = por %p501_p9, %p500_p6 }
  0x6e   : > { %p498_p4 = pneg %p497_p1 }
  0x6f   : > { %p504_p5 = por %p503_p2, %p502_p11 }
  0x71   : > { %p505_p8 = pnand %p504_p5, %p498_p4 }
  0x73   : > { %508 = shalt.err (!%p505_p8)
}
  0x74   : > { %s573_s17 = smov 64   ;;  %s574_s20 = smov 4  }
  0x75   : > { %363 = dma.vmem_to_hbm [thread:$0]  (%p806_p3), %s741_s25, 192, %s746_s23, %s229_s26, %s573_s17, %s573_s17, %s574_s20  }
  0x76 PF: > { %s258_s24 = sand.u32 1, %s545_s0   ;;  %p807_p0 = scmp.ne.s32.totalorder %s803_s13, 0 }
  0x77   : > { %p808_p7 = scmp.ge.s32.totalorder %s565_s30, 2  ;;  %s259_s22 = scalar_lea.sflag [#allocation7], %s258_s24 }
  0x79   : > { %p370_p10 = pnand %p808_p7, %p807_p0 }
  0x7b   : > { %540 = dma.done.wait (!%p370_p10), %s259_s22, 192  }
  0x7c   : > { %542 = vsyncadd (!%p370_p10), %s259_s22, 4294967104  ;;  %s27_s30 = sadd.s32 1, %s565_s30   ;;  %s809_s0 = smov %s549_s1 }
  0x7d   : > { %p24_p13 = scmp.ge.s32.totalorder %s27_s30, 4   ;;  %s810_s1 = smov %s553_s27 }
  0x7e   : > { %s811_s27 = smov %s666_s12  ;;  %s812_s28 = smov %s561_s29 }
  0x7f   : > { %s813_s29 = smov %s815_s6  ;;  %26 = sbr.rel (!%p24_p13) target bundleno = 28 (0x1c), region = 74 }
  0x86   :  { %264 = vsyncpa [#allocation6], 1 }
  0x87   :  { %266 = vsyncpa [#allocation6 + $0x1], 1 }
  0x88   :  { %267 = vsyncpa [#allocation7], 1 }
  0x89   :  { %269 = vsyncpa [#allocation7 + $0x1], 1 }

</bundles_post_ra>
